<compile_context>
chip_gen: v6e
topology: v6e:2x2x1
jax: 0.10.0
libtpu: 0.0.40
codegen_flags: <defaults>
</compile_context>

<pallas_src>
import jax
import jax.numpy as jnp
from jax import lax
from jax.experimental import pallas as pl
from jax.experimental.pallas import tpu as pltpu


def _decorr_kernel(x_ref, gram_ref, stats_ref):
    """Accumulate gram = sum_n x x^T and scalar stats for one core-chunk."""
    i = pl.program_id(1)

    @pl.when(i == 0)
    def _init():
        gram_ref[...] = jnp.zeros_like(gram_ref)
        stats_ref[...] = jnp.zeros_like(stats_ref)

    x = x_ref[...]                                           # (TN, D) float32
    xsq = x * x

    sum_sq = jnp.sum(xsq, axis=1, keepdims=True)             # (TN, 1) sum_i x_i^2
    sum_q4 = jnp.sum(xsq * xsq, axis=1, keepdims=True)       # (TN, 1) sum_i x_i^4

    # sum_n sum_{i,j} C^2  ==  sum_n [(sum_i x_i^2)^2 - sum_i x_i^4]
    corr_t = jnp.sum(sum_sq * sum_sq - sum_q4, axis=0, keepdims=True)   # (1, 1)
    sumq4_t = jnp.sum(sum_q4, axis=0, keepdims=True)                    # (1, 1)

    # Pack the two running scalars into a single lane-dense (1, 128) accumulator
    # (unmasked full-vreg store each step instead of masked scalar stores).
    # The third stat the losses need (sum_n sum_i x_i^2) equals trace(gram) and
    # is recovered in the wrapper.
    lane = lax.broadcasted_iota(jnp.int32, (1, 128), 1)
    contrib = (jnp.where(lane == 0, corr_t, 0.0)
               + jnp.where(lane == 1, sumq4_t, 0.0))
    stats_ref[...] += contrib

    # sum_n x x^T : contract the leading sample axis directly on the MXU
    # (no explicit transpose of the input tile).
    gram_ref[...] += lax.dot_general(
        x, x, (((0,), (0,)), ((), ())), preferred_element_type=jnp.float32)


def _pick_tile_n(n, d, num_chunks, vmem_budget_bytes=36 * 1024 * 1024):
    """Largest sample tile (multiple of 8, <=1024) that fits the VMEM budget."""
    bytes_per_row = d * 4
    # resident: (D, D) gram output block (assume double-buffered) + stats block
    reserved = 2 * d * d * 4 + 2 * 128 * 4
    avail = max(vmem_budget_bytes - reserved, 2 * 8 * bytes_per_row)
    tile = avail // (2 * bytes_per_row)          # input tile is double-buffered
    tile = int(max(8, min(tile, 1024)))
    rows_per_chunk = -(-n // num_chunks)         # no point tiling wider than the work
    tile = min(tile, ((rows_per_chunk + 7) // 8) * 8)
    return max(8, (tile // 8) * 8)


def decorr_loss(x, kappa, *, tile_n=None, num_chunks=2):
    """Pallas implementation of DecorrLoss.forward (non-batched path).

    Args:
      x:          (B, L, D) float array.
      kappa:      python float in [0, 1].
      tile_n:     optional sample-tile override (multiple of 8). Auto-sized if None.
      num_chunks: number of independent partial accumulators (leading "parallel"
                  grid axis; 2 lets v7x megacore split the N axis across cores).
    Returns:
      grad (D, D) float32, correlation_loss scalar, whitening_loss scalar.
    """
    assert 0.0 <= kappa <= 1.0, "kappa must be between 0 and 1"
    b, l, d = x.shape
    n = b * l
    xf = x.reshape(n, d).astype(jnp.float32)

    if tile_n is None:
        tile_n = _pick_tile_n(n, d, num_chunks)
    assert tile_n % 8 == 0, "tile_n must be a multiple of 8"

    tiles_per_chunk = pl.cdiv(n, num_chunks * tile_n)
    n_pad = num_chunks * tiles_per_chunk * tile_n
    if n_pad != n:
        # Zero rows contribute nothing to gram / corr / q4 partials, so this
        # padding needs no masking (loss normalizers use the *true* N below).
        xf = jnp.pad(xf, ((0, n_pad - n), (0, 0)))

    vmem_limit = 2 * tile_n * d * 4 + 4 * d * d * 4 + (4 << 20)
    vmem_limit = int(min(max(vmem_limit, 32 << 20), 100 << 20))

    cost = pl.CostEstimate(
        flops=2 * n_pad * d * d + 8 * n_pad * d,
        transcendentals=0,
        bytes_accessed=4 * n_pad * d + num_chunks * (4 * d * d + 4 * 128),
    )

    gram_parts, stats_parts = pl.pallas_call(
        _decorr_kernel,
        out_shape=(
            jax.ShapeDtypeStruct((num_chunks, d, d), jnp.float32),
            jax.ShapeDtypeStruct((num_chunks, 1, 128), jnp.float32),
        ),
        grid_spec=pltpu.PrefetchScalarGridSpec(
            num_scalar_prefetch=0,
            grid=(num_chunks, tiles_per_chunk),
            in_specs=[
                pl.BlockSpec((tile_n, d),
                             lambda c, i: (c * tiles_per_chunk + i, 0)),
            ],
            out_specs=[
                pl.BlockSpec((None, d, d), lambda c, i: (c, 0, 0)),
                pl.BlockSpec((None, 1, 128), lambda c, i: (c, 0, 0)),
            ],
        ),
        compiler_params=pltpu.CompilerParams(
            dimension_semantics=("parallel", "arbitrary"),
            vmem_limit_bytes=vmem_limit),
        cost_estimate=cost,
    )(xf)

    # Tiny O(D^2) finalize in plain JAX (negligible vs streaming N*D through HBM).
    gram = jnp.sum(gram_parts, axis=0)                 # sum_n x x^T
    stats = jnp.sum(stats_parts, axis=0)               # (1, 128)
    corr_sum, sumq4 = stats[0, 0], stats[0, 1]
    sumsq = jnp.trace(gram)                            # sum_n sum_i x_i^2

    n_f = float(n)
    m = gram / n_f                                     # mean_n x x^T (diag = mean x_i^2)
    eye = jnp.eye(d, dtype=jnp.float32)
    mean_c = m * (1.0 - eye)                           # mean_n C (zero diagonal)
    mean_v = (m - 1.0) * eye                           # mean_n V (diagonal only)
    grad = (1.0 - kappa) * mean_c + kappa * mean_v

    denom = n_f * float(d) * float(d)
    correlation_loss = corr_sum / denom
    whitening_loss = (sumq4 - 2.0 * sumsq + n_f * float(d)) / denom
    return grad, correlation_loss, whitening_loss


def decorr_loss_ref(x, kappa):
    """Pure-JAX reference mirroring the PyTorch code line by line."""
    b, l, d = x.shape
    xf = x.reshape(b * l, d).astype(jnp.float32)
    d_mat = jax.vmap(jnp.diag)(xf ** 2)                # diag_embed
    v = d_mat - jnp.eye(d, dtype=jnp.float32)
    xx_t = jnp.einsum("ni,nj->nij", xf, xf)
    c = xx_t - d_mat
    correlation_loss = jnp.mean(jnp.mean(c ** 2, axis=(1, 2)))
    whitening_loss = jnp.mean(jnp.mean(v ** 2, axis=(1, 2)))
    grad = jnp.mean((1.0 - kappa) * c + kappa * v, axis=0)
    return grad, correlation_loss, whitening_loss


if __name__ == "__main__":
    key = jax.random.PRNGKey(0)
    k1, k2 = jax.random.split(key)

    # primary test: module's (B, L, D) layout
    B, L, D = 2, 8, 32
    kappa = 0.5
    x = jax.random.normal(k1, (B, L, D), dtype=jnp.float32)

    grad, corr, whit = decorr_loss(x, kappa)
    jax.block_until_ready((grad, corr, whit))

    grad_r, corr_r, whit_r = decorr_loss_ref(x, kappa)
    assert jnp.allclose(grad, grad_r, atol=1e-5, rtol=1e-5), "grad mismatch"
    assert jnp.allclose(corr, corr_r, atol=1e-5, rtol=1e-5), "corr loss mismatch"
    assert jnp.allclose(whit, whit_r, atol=1e-5, rtol=1e-5), "whit loss mismatch"

    # second test: B*L not divisible by the tile -> exercises the zero-pad path
    B2, L2, D2 = 3, 7, 32
    x2 = jax.random.normal(k2, (B2, L2, D2), dtype=jnp.float32)
    g2, c2, w2 = decorr_loss(x2, 0.25)
    jax.block_until_ready((g2, c2, w2))
    g2r, c2r, w2r = decorr_loss_ref(x2, 0.25)
    assert jnp.allclose(g2, g2r, atol=1e-5, rtol=1e-5), "grad mismatch (pad)"
    assert jnp.allclose(c2, c2r, atol=1e-5, rtol=1e-5), "corr mismatch (pad)"
    assert jnp.allclose(w2, w2r, atol=1e-5, rtol=1e-5), "whit mismatch (pad)"

    print("KERNEL_OK")
</pallas_src>

<mosaic_0001>
module attributes {stable_mosaic.version = 11 : i64} {
  func.func @_decorr_kernel(%arg0: i32, %arg1: i32, %arg2: memref<8x32xf32, #tpu.memory_space<vmem>>, %arg3: memref<1x32x32xf32, #tpu.memory_space<vmem>>, %arg4: memref<1x1x128xf32, #tpu.memory_space<vmem>>) attributes {dimension_semantics = [#tpu.dimension_semantics<parallel>, #tpu.dimension_semantics<arbitrary>], iteration_bounds = array<i64: 2, 1>, scalar_prefetch = 0 : i64, scratch_operands = 0 : i64, tpu.core_type = #tpu.core_type<tc>, window_params = [{transform_indices = @transform_0, window_bounds = array<i64: 8, 32>}, {transform_indices = @transform_1, window_bounds = array<i64: 1, 32, 32>}, {transform_indices = @transform_2, window_bounds = array<i64: 1, 1, 128>}]} {
    %c0_i32 = arith.constant 0 : i32
    %0 = arith.cmpi eq, %arg1, %c0_i32 : i32
    %1 = arith.extui %0 : i1 to i32
    %c0_i32_0 = arith.constant 0 : i32
    %2 = arith.cmpi ne, %1, %c0_i32_0 : i32
    scf.if %2 {
      %cst_21 = arith.constant 0.000000e+00 : f32
      %43 = vector.broadcast %cst_21 : f32 to vector<32x32xf32>
      %c0_22 = arith.constant 0 : index
      %c0_23 = arith.constant 0 : index
      %c0_24 = arith.constant 0 : index
      %44 = vector.load %arg3[%c0_22, %c0_23, %c0_24] : memref<1x32x32xf32, #tpu.memory_space<vmem>>, vector<1x32x32xf32>
      %45 = vector.shape_cast %44 : vector<1x32x32xf32> to vector<32x32xf32>
      %46 = vector.shape_cast %43 : vector<32x32xf32> to vector<1x32x32xf32>
      tpu.vector_store %arg3[%c0_22, %c0_23, %c0_24], %46 {strides = array<i32>} : memref<1x32x32xf32, #tpu.memory_space<vmem>>, vector<1x32x32xf32>,
      %cst_25 = arith.constant 0.000000e+00 : f32
      %47 = vector.broadcast %cst_25 : f32 to vector<1x128xf32>
      %c0_26 = arith.constant 0 : index
      %c0_27 = arith.constant 0 : index
      %c0_28 = arith.constant 0 : index
      %48 = vector.load %arg4[%c0_26, %c0_27, %c0_28] : memref<1x1x128xf32, #tpu.memory_space<vmem>>, vector<1x1x128xf32>
      %49 = vector.shape_cast %48 : vector<1x1x128xf32> to vector<1x128xf32>
      %50 = vector.shape_cast %47 : vector<1x128xf32> to vector<1x1x128xf32>
      tpu.vector_store %arg4[%c0_26, %c0_27, %c0_28], %50 {strides = array<i32>} : memref<1x1x128xf32, #tpu.memory_space<vmem>>, vector<1x1x128xf32>,
    } else {
    }
    %c0 = arith.constant 0 : index
    %c0_1 = arith.constant 0 : index
    %3 = vector.load %arg2[%c0, %c0_1] : memref<8x32xf32, #tpu.memory_space<vmem>>, vector<8x32xf32>
    %4 = arith.mulf %3, %3 : vector<8x32xf32>
    %cst = arith.constant dense<0.000000e+00> : vector<8xf32>
    %5 = vector.multi_reduction <add>, %4, %cst [1] : vector<8x32xf32> to vector<8xf32>
    %6 = vector.shape_cast %5 : vector<8xf32> to vector<8x1xf32>
    %7 = arith.mulf %4, %4 : vector<8x32xf32>
    %cst_2 = arith.constant dense<0.000000e+00> : vector<8xf32>
    %8 = vector.multi_reduction <add>, %7, %cst_2 [1] : vector<8x32xf32> to vector<8xf32>
    %9 = vector.shape_cast %8 : vector<8xf32> to vector<8x1xf32>
    %10 = arith.mulf %6, %6 : vector<8x1xf32>
    %11 = arith.subf %10, %9 : vector<8x1xf32>
    %cst_3 = arith.constant dense<0.000000e+00> : vector<1xf32>
    %12 = vector.multi_reduction <add>, %11, %cst_3 [0] : vector<8x1xf32> to vector<1xf32>
    %13 = vector.shape_cast %12 : vector<1xf32> to vector<1x1xf32>
    %cst_4 = arith.constant dense<0.000000e+00> : vector<1xf32>
    %14 = vector.multi_reduction <add>, %9, %cst_4 [0] : vector<8x1xf32> to vector<1xf32>
    %15 = vector.shape_cast %14 : vector<1xf32> to vector<1x1xf32>
    %16 = tpu.iota {dimensions = array<i32: 1>} : vector<1x128xi32>
    %c0_i32_5 = arith.constant 0 : i32
    %17 = vector.broadcast %c0_i32_5 : i32 to vector<1x128xi32>
    %18 = arith.cmpi eq, %16, %17 : vector<1x128xi32>
    %cst_6 = arith.constant 0.000000e+00 : f32
    %19 = vector.shape_cast %13 : vector<1x1xf32> to vector<1x1xf32>
    %20 = vector.broadcast %19 : vector<1x1xf32> to vector<1x128xf32>
    %21 = vector.broadcast %cst_6 : f32 to vector<1x128xf32>
    %22 = arith.select %18, %20, %21 : vector<1x128xi1>, vector<1x128xf32>
    %c1_i32 = arith.constant 1 : i32
    %23 = vector.broadcast %c1_i32 : i32 to vector<1x128xi32>
    %24 = arith.cmpi eq, %16, %23 : vector<1x128xi32>
    %cst_7 = arith.constant 0.000000e+00 : f32
    %25 = vector.shape_cast %15 : vector<1x1xf32> to vector<1x1xf32>
    %26 = vector.broadcast %25 : vector<1x1xf32> to vector<1x128xf32>
    %27 = vector.broadcast %cst_7 : f32 to vector<1x128xf32>
    %28 = arith.select %24, %26, %27 : vector<1x128xi1>, vector<1x128xf32>
    %29 = arith.addf %22, %28 : vector<1x128xf32>
    %c0_8 = arith.constant 0 : index
    %c0_9 = arith.constant 0 : index
    %c0_10 = arith.constant 0 : index
    %30 = vector.load %arg4[%c0_8, %c0_9, %c0_10] : memref<1x1x128xf32, #tpu.memory_space<vmem>>, vector<1x1x128xf32>
    %31 = vector.shape_cast %30 : vector<1x1x128xf32> to vector<1x128xf32>
    %32 = arith.addf %31, %29 : vector<1x128xf32>
    %c0_11 = arith.constant 0 : index
    %c0_12 = arith.constant 0 : index
    %c0_13 = arith.constant 0 : index
    %33 = vector.load %arg4[%c0_11, %c0_12, %c0_13] : memref<1x1x128xf32, #tpu.memory_space<vmem>>, vector<1x1x128xf32>
    %34 = vector.shape_cast %33 : vector<1x1x128xf32> to vector<1x128xf32>
    %35 = vector.shape_cast %32 : vector<1x128xf32> to vector<1x1x128xf32>
    tpu.vector_store %arg4[%c0_11, %c0_12, %c0_13], %35 {strides = array<i32>} : memref<1x1x128xf32, #tpu.memory_space<vmem>>, vector<1x1x128xf32>,
    %c0_14 = arith.constant 0 : index
    %c0_15 = arith.constant 0 : index
    %c0_16 = arith.constant 0 : index
    %36 = vector.load %arg3[%c0_14, %c0_15, %c0_16] : memref<1x32x32xf32, #tpu.memory_space<vmem>>, vector<1x32x32xf32>
    %37 = vector.shape_cast %36 : vector<1x32x32xf32> to vector<32x32xf32>
    %cst_17 = arith.constant dense<0.000000e+00> : vector<32x32xf32>
    %38 = tpu.matmul %3, %3, %cst_17 {dimension_numbers = #tpu.dot_dimension_numbers<[0], [0], [1], [1], [0, 1, 1, 1], [], []>} : vector<8x32xf32>, vector<8x32xf32>, vector<32x32xf32> -> vector<32x32xf32>
    %39 = arith.addf %37, %38 : vector<32x32xf32>
    %c0_18 = arith.constant 0 : index
    %c0_19 = arith.constant 0 : index
    %c0_20 = arith.constant 0 : index
    %40 = vector.load %arg3[%c0_18, %c0_19, %c0_20] : memref<1x32x32xf32, #tpu.memory_space<vmem>>, vector<1x32x32xf32>
    %41 = vector.shape_cast %40 : vector<1x32x32xf32> to vector<32x32xf32>
    %42 = vector.shape_cast %39 : vector<32x32xf32> to vector<1x32x32xf32>
    tpu.vector_store %arg3[%c0_18, %c0_19, %c0_20], %42 {strides = array<i32>} : memref<1x32x32xf32, #tpu.memory_space<vmem>>, vector<1x32x32xf32>,
    return
  }
  func.func @transform_0(%arg0: i32, %arg1: i32) -> (i32, i32) {
    %c1_i32 = arith.constant 1 : i32
    %0 = arith.muli %arg0, %c1_i32 : i32
    %1 = arith.addi %0, %arg1 : i32
    %c0_i32 = arith.constant 0 : i32
    %c0_i32_0 = arith.constant 0 : i32
    return %1, %c0_i32 : i32, i32
  }
  func.func @transform_1(%arg0: i32, %arg1: i32) -> (i32, i32, i32) {
    %c0_i32 = arith.constant 0 : i32
    %c0_i32_0 = arith.constant 0 : i32
    %c0_i32_1 = arith.constant 0 : i32
    return %arg0, %c0_i32, %c0_i32_0 : i32, i32, i32
  }
  func.func @transform_2(%arg0: i32, %arg1: i32) -> (i32, i32, i32) {
    %c0_i32 = arith.constant 0 : i32
    %c0_i32_0 = arith.constant 0 : i32
    %c0_i32_1 = arith.constant 0 : i32
    return %arg0, %c0_i32, %c0_i32_0 : i32, i32, i32
  }
}

</mosaic_0001>

<bundles_post_ra>
// kernel: tpu_custom_call.1
= control target key start
LH: loop header
LB: loop body
LE: loop exit
PB: predicated region body
PF: predicated region fallthrough
CT: control target
= control target key end

     0   :  { %8 = vsyncpa [#allocation3], 0  ;;  %s970_s0 = inlined_call_operand.hbm [shape: f32[16,32], index: 0, kind: input, shape index: {}]   ;;  %s971_s1 = inlined_call_operand.hbm [shape: f32[2,32,32], index: 1, kind: output, shape index: {0}]   ;;  %s972_s2 = inlined_call_operand.hbm [shape: f32[2,1,128], index: 2, kind: output, shape index: {1}]  }
   0x1   :  { %10 = vsyncpa [#allocation3 + $0x1], 0 }
   0x2   :  { %11 = vsyncpa [#allocation4], 0 }
   0x3   :  { %13 = vsyncpa [#allocation4 + $0x1], 0 }
   0x4   :  { %14 = vsyncpa [#allocation7], 0 }
   0x5   :  { %16 = vsyncpa [#allocation7 + $0x1], 0  ;;  %s778_s9 = smov 0   ;;  %s780_s10 = smov 0  }
   0x6   :  { %s782_s11 = smov 0   ;;  %s784_s12 = smov 0  }
   0x7   :  { %s786_s13 = smov 0   ;;  %s788_s14 = smov 0  }
   0x8 LB: > { %s512_s15 = sadd.s32 4294967295, %s755_s14   ;;  %s513_s16 = sadd.s32 4294967294, %s755_s14   ;;  %s755_s14 = sphi %s788_s14, %s22_s14   ;;  %s751_s13 = sphi %s786_s13, %s984_s13   ;;  %s747_s12 = sphi %s784_s12, %s983_s12   ;;  %s743_s11 = sphi %s782_s11, %s982_s11   ;;  %s739_s10 = sphi %s780_s10, %s981_s10   ;;  %s735_s9 = sphi %s778_s9, %s980_s9  }
   0x9   : > { %s34_s17 = sadd.s32 1, %s751_s13  ;;  %s43_s18 = sadd.s32 1, %s743_s11 }
   0xa   : > { %p36_p0 = scmp.ge.s32.totalorder %s34_s17, 2  ;;  %p50_p1 = scmp.ne.s32.totalorder %s743_s11, %s739_s10 }
   0xb   : > { %p51_p2 = scmp.eq.s32.totalorder %s755_s14, 0  ;;  %p56_p3 = scmp.ne.s32.totalorder %s739_s10, %s735_s9 }
   0xc   : > { %s986_s17 = smov (%p36_p0, %s34_s17), 0  ;;  %p57_p5 = scmp.eq.s32.totalorder %s512_s15, 0 }
   0xd   : > { %p819_p4 = por %p51_p2, %p50_p1  ;;  %s40_s20 = ssub.s32 %s751_s13, %s986_s17 }
   0xe   : > { %p80_p6 = scmp.eq.s32.totalorder %s512_s15, 1  ;;  %p41_p7 = scmp.eq.s32.totalorder %s40_s20, 0 }
   0xf   : > { %p825_p8 = por %p57_p5, %p56_p3  ;;  %p86_p10 = scmp.eq.s32.totalorder %s513_s16, 1 }
  0x10   : > { %p829_p9 = por %p80_p6, %p50_p1  ;;  %p564_p13 = scmp.lt.s32.totalorder %s755_s14, 2 }
  0x11   : > { %s834_s23 = scalar_select %p41_p7, %s743_s11, %s43_s18  }
  0x12   : > { %p836_p11 = por %p86_p10, %p56_p3  ;;  %s132_s25 = sand.u32 1, %s743_s11  }
  0x13   : > { %s516_s26 = sshll.u32 %s132_s25, 3  ;;  %s517_s27 = sshll.u32 %s751_s13, 7 }
  0x14   : > { %s976_s24 = scalar_select %p836_p11, 1, 0 }
  0x15   : > { %s142_s30 = scalar_lea.hbm %s970_s0, %s517_s27  ;;  %s136_s3 = scalar_lea.vmem [#allocation2], %s516_s26 }
  0x16   : > { %s144_s4 = sshll.u32 %s136_s3, 4  ;;  %p849_p0 = pnand %p564_p13, %p819_p4  ;;  %s145_s4 = int_to_ptr.vmem [resolvable:$true] %s144_s4 }
  0x17   : > { %p518_p1 = scmp.ge.s32.totalorder %s755_s14, 1  ;;  %p149_p2 = scmp.lt.s32.totalorder %s755_s14, 3 }
  0x18   : > { %s133_s6 = scalar_lea.sflag [#allocation3], %s132_s25  ;;  %p619_p3 = pneg %p849_p0 }
  0x19   : > { %s630_s7 = scalar_lea.vmem %s145_s4, 128  ;;  %s757_s8 = smov [#allocation2]  }
  0x1a   : > { %p631_p5 = scmp.ne.s32.totalorder %s145_s4, %s630_s7  ;;  %s635_s15 = sshll.u32 %s757_s8, 4  ;;  %s636_s15 = int_to_ptr.vmem [resolvable:$false] %s635_s15 }
  0x1b   : > { %s637_s16 = scalar_lea.vmem %s636_s15, 256  ;;  %p638_p10 = scmp.lt.s32.totalorder %s145_s4, %s636_s15 }
  0x1c   : > { %p633_p6 = pnand %p631_p5, %p619_p3  ;;  %p639_p12 = scmp.lt.s32.totalorder %s637_s16, %s630_s7 }
  0x1e   : > { %p634_p7 = pneg %p633_p6  ;;  %p640_p4 = por %p639_p12, %p638_p10 }
  0x20   : > { %p641_p13 = pnand %p640_p4, %p634_p7 }
  0x22   : > { %644 = shalt.err (!%p641_p13)
}
  0x23   : > { %556 = dma.hbm_to_vmem [thread:$0]  (!%p849_p0), %s142_s30, 128, %s145_s4, %s133_s6  }
  0x24   : > { %p150_p11 = pnand %p518_p1, %p149_p2 }
  0x25   : > { %s864_s18 = sand.u32 (!%p150_p11), 1, %s739_s10  }
  0x26   : > { %153 = sbr.rel (%p150_p11) target bundleno = 393 (0x189), region = 24  ;;  %s519_s19 = sshll.u32 (!%p150_p11), %s864_s18, 3 }
  0x27   : > { %s156_s20 = scalar_lea.sflag (!%p150_p11), [#allocation3], %s864_s18  ;;  %s159_s25 = scalar_lea.vmem (!%p150_p11), [#allocation2], %s519_s19 }
  0x2b   : > { %722 = dma.done.wait (%p825_p8), %s156_s20, 128  }
  0x2c   : > { %724 = vsyncadd (%p825_p8), %s156_s20, 4294967168  ;;  %v195_v0 = vld [vmem:[%s159_s25] sm:$0xff]  ;;  %vm189_vm0 = vcmask 261120   ;;  %s520_s26 = sshll.u32 %s864_s18, 5  ;;  %v758_v5 = vmov 0.0   ;;  %vm265_vm1 = vcmask 64512   ;;  %v219_v18 = vlaneseq }
  0x2d   : > { %233 = vxpose.xlu0.b32.start.end [1/1] (short) (narrow) %v195_v0, 32  ;;  %537 = vmatprep.subr.mxu0 %v195_v0  ;;  %v196_v1 = vmul.f32 %v195_v0, %v195_v0  ;;  %s875_s27 = scalar_lea.vmem [#allocation5], %s520_s26  ;;  %s183_s21 = scalar_lea.vmem [#allocation6], %s864_s18 }
  0x2e   : > { %538 = vmatpush3.msra.mxu0 %v195_v0  ;;  %545 = vmatprep.subr.mxu1 %v195_v0  ;;  %191 = vst.msk [vmem:[%s875_s27 + $0x8] sm:$0xff] %vm189_vm0, %v758_v5  ;;  %190 = vst.msk [vmem:[%s875_s27] sm:$0xff] %vm189_vm0, %v758_v5  ;;  %v220_v22 = vand.u32 127, %v219_v18  ;;  %s528_s28 = sshll.u32 %s747_s12, 4  ;;  %s405_s29 = sshll.u32 %s183_s21, 4  ;;  %s406_s29 = int_to_ptr.vmem [resolvable:$true] %s405_s29 }
  0x2f   : > { %546 = vmatpush3.msra.mxu1 %v195_v0  ;;  %v201_v2 = vmul.f32 %v196_v1, %v196_v1  ;;  %v198_v4 = vsel %vm189_vm0, %v196_v1, 0.0  ;;  %192 = vst.msk [vmem:[%s875_s27 + $0x10] sm:$0xff] %vm189_vm0, %v758_v5  ;;  %193 = vst.msk [vmem:[%s875_s27 + $0x18] sm:$0xff] %vm189_vm0, %v758_v5  ;;  %s403_s4 = scalar_lea.hbm %s972_s2, %s528_s28  ;;  %s377_s5 = scalar_lea.sflag [#allocation7], %s864_s18 }
  0x30   : > { %194 = vst [vmem:[%s183_s21] sm:$0x1] %v758_v5  ;;  %vm223_vm2 = vcmp.eq.s32.totalorder %v220_v22, 1  ;;  %vm221_vm3 = vcmp.eq.s32.totalorder %v220_v22, 0  ;;  %s645_s6 = scalar_lea.vmem %s406_s29, 16  ;;  %s759_s7 = smov [#allocation6]  }
  0x31   : > { %v202_v3 = vsel %vm189_vm0, %v201_v2, 0.0  ;;  %p646_p8 = scmp.ne.s32.totalorder %s406_s29, %s645_s6  ;;  %s649_s8 = sshll.u32 %s759_s7, 4  ;;  %s650_s8 = int_to_ptr.vmem [resolvable:$false] %s649_s8 }
  0x32   : > { %203 = vadd.xlane.f32.xlu1 %v202_v3  ;;  %s651_s15 = scalar_lea.vmem %s650_s8, 32  ;;  %p652_p0 = scmp.lt.s32.totalorder %s406_s29, %s650_s8 }
  0x33   : > { %p647_p11 = pnand %p646_p8, %p829_p9  ;;  %p653_p1 = scmp.lt.s32.totalorder %s651_s15, %s645_s6 }
  0x35   : > { %p648_p12 = pneg %p647_p11  ;;  %p654_p2 = por %p653_p1, %p652_p0 }
  0x37   : > { %v226_v30 = vld [vmem:[%s183_s21] sm:$0x1]  ;;  %p655_p3 = pnand %p654_p2, %p648_p12 }
  0x66   : > { %199 = vadd.xlane.f32.xlu0 %v198_v4 }
  0xa9   : > { %v249_v6 = vpop.trf.xlu0 }
  0xaa   : > { %539 = vmatprep.mubr.msk.f32.mxu0 %vm265_vm1, %v249_v6 }
  0xad   : > { %v250_v7 = vpop.trf.xlu0 }
  0xae   : > { %540 = vmatmul.mubr.msk.f32.vlgmr.msra.gmra.mxu0 %vm265_vm1, %v250_v7 }
  0xb1   : > { %v251_v8 = vpop.trf.xlu0 }
  0xb2   : > { %542 = vmatprep.mubr.msk.f32.mxu1 %vm265_vm1, %v251_v8 }
  0xb5   : > { %v252_v9 = vpop.trf.xlu0 }
  0xb6   : > { %543 = vmatmul.mubr.msk.f32.vlgmr.msra.gmra.mxu1 %vm265_vm1, %v252_v9 }
  0xbb   : > { %v204_v10 = vpop.xlane.xlu1 %203 }
  0xbc   : > { %v213_v11 = vrot.slane %v204_v10, 4 }
  0xbe   : > { %v214_v12 = vadd.f32 %v213_v11, %v204_v10 }
  0xc0   : > { %v215_v13 = vrot.slane %v214_v12, 2 }
  0xc2   : > { %v216_v17 = vadd.f32 %v215_v13, %v214_v12 }
  0xc4   : > { %v217_v21 = vrot.slane %v216_v17, 1 }
  0xc6   : > { %v218_v25 = vadd.f32 %v217_v21, %v216_v17 }
  0xc8   : > { %v224_v28 = vsel %vm223_vm2, %v218_v25, 0.0 }
  0xef   : > { %v200_v14 = vpop.xlane.xlu0 %199 }
  0xf0   : > { %v205_v15 = vmul.f32 %v200_v14, %v200_v14 }
  0xf2   : > { %v206_v16 = vsub.f32 %v205_v15, %v204_v10 }
  0xf4   : > { %v207_v19 = vrot.slane %v206_v16, 4 }
  0xf6   : > { %v208_v20 = vadd.f32 %v207_v19, %v206_v16 }
  0xf8   : > { %v209_v23 = vrot.slane %v208_v20, 2 }
  0xfa   : > { %v210_v24 = vadd.f32 %v209_v23, %v208_v20 }
  0xfc   : > { %v211_v26 = vrot.slane %v210_v24, 1 }
  0xfe   : > { %v212_v27 = vadd.f32 %v211_v26, %v210_v24 }
 0x100   : > { %v222_v29 = vsel %vm221_vm3, %v212_v27, 0.0 }
 0x101   : > { %v225_v31 = vadd.f32 %v224_v28, %v222_v29 }
 0x103   : > { %v227_v32 = vadd.f32 %v226_v30, %v225_v31 }
 0x105   : > { %228 = vst [vmem:[%s183_s21] sm:$0x1] %v227_v32 }
 0x106   : > { %658 = shalt.err (!%p655_p3)
}
 0x107   : > { %s659_s16 = scalar_lea.hbm %s403_s4, 16  ;;  %s663_s25 = scalar_lea.hbm %s972_s2, 32 }
 0x108   : > { %p660_p5 = scmp.ne.s32.totalorder %s403_s4, %s659_s16  ;;  %p664_p10 = scmp.lt.s32.totalorder %s403_s4, %s972_s2 }
 0x109   : > { %p665_p4 = scmp.lt.s32.totalorder %s663_s25, %s659_s16 }
 0x10a   : > { %p661_p6 = pnand %p660_p5, %p829_p9 }
 0x10b   : > { %p666_p13 = por %p665_p4, %p664_p10 }
 0x10c   : > { %p662_p7 = pneg %p661_p6 }
 0x10e   : > { %p667_p8 = pnand %p666_p13, %p662_p7 }
 0x110   : > { %670 = shalt.err (!%p667_p8)
}
 0x111   : > { %550 = dma.vmem_to_hbm [thread:$0]  (%p829_p9), %s406_s29, 16, %s403_s4, %s377_s5   ;;  %v230_v33 = vld [vmem:[%s875_s27 + $0x8] sm:$0xff]  ;;  %v229_v35 = vld [vmem:[%s875_s27] sm:$0xff]  ;;  %v232_v39 = vld [vmem:[%s875_s27 + $0x18] sm:$0xff] }
 0x112   : > { %s531_s28 = sshll.u32 %s747_s12, 9  ;;  %s389_s30 = sshll.u32 %s875_s27, 4  ;;  %v231_v41 = vld [vmem:[%s875_s27 + $0x10] sm:$0xff]  ;;  %s918_s30 = int_to_ptr.vmem [resolvable:$true] %s389_s30 }
 0x113   : > { %s916_s4 = scalar_lea.hbm %s971_s1, %s531_s28  ;;  %s372_s12 = scalar_lea.sflag [#allocation4], %s864_s18 }
 0x114   : > { %s671_s5 = scalar_lea.vmem %s918_s30, 512  ;;  %s760_s6 = smov [#allocation5]  }
 0x115   : > { %p672_p11 = scmp.ne.s32.totalorder %s918_s30, %s671_s5  ;;  %s675_s7 = sshll.u32 %s760_s6, 4  ;;  %s676_s7 = int_to_ptr.vmem [resolvable:$false] %s675_s7 }
 0x116   : > { %s677_s8 = scalar_lea.vmem %s676_s7, 1024  ;;  %p678_p1 = scmp.lt.s32.totalorder %s918_s30, %s676_s7 }
 0x117   : > { %p673_p12 = pnand %p672_p11, %p829_p9  ;;  %p679_p2 = scmp.lt.s32.totalorder %s677_s8, %s671_s5 }
 0x119   : > { %p674_p0 = pneg %p673_p12  ;;  %p680_p3 = por %p679_p2, %p678_p1 }
 0x11b   : > { %p681_p5 = pnand %p680_p3, %p674_p0 }
 0x16e   : > { %v541_v34 = vpop.f32.mrf.mxu0 }
 0x16f   : > { %v364_v36 = vadd.f32 %v541_v34, %v230_v33 }
 0x170   : > { %v344_v37 = vpop.f32.mrf.mxu0 }
 0x171   : > { %368 = vst.msk [vmem:[%s875_s27 + $0x8] sm:$0xff] %vm189_vm0, %v364_v36  ;;  %v363_v38 = vadd.f32 %v344_v37, %v229_v35 }
 0x173   : > { %367 = vst.msk [vmem:[%s875_s27] sm:$0xff] %vm189_vm0, %v363_v38 }
 0x176   : > { %v544_v40 = vpop.f32.mrf.mxu1 }
 0x177   : > { %v366_v42 = vadd.f32 %v544_v40, %v232_v39 }
 0x178   : > { %v354_v43 = vpop.f32.mrf.mxu1 }
 0x179   : > { %370 = vst.msk [vmem:[%s875_s27 + $0x18] sm:$0xff] %vm189_vm0, %v366_v42  ;;  %v365_v44 = vadd.f32 %v354_v43, %v231_v41 }
 0x17b   : > { %369 = vst.msk [vmem:[%s875_s27 + $0x10] sm:$0xff] %vm189_vm0, %v365_v44 }
 0x17c   : > { %684 = shalt.err (!%p681_p5)
}
 0x17d   : > { %s685_s27 = scalar_lea.hbm %s916_s4, 512  ;;  %s689_s19 = scalar_lea.hbm %s971_s1, 1024 }
 0x17e   : > { %p686_p6 = scmp.ne.s32.totalorder %s916_s4, %s685_s27  ;;  %p690_p4 = scmp.lt.s32.totalorder %s916_s4, %s971_s1 }
 0x17f   : > { %p691_p13 = scmp.lt.s32.totalorder %s689_s19, %s685_s27 }
 0x180   : > { %p687_p7 = pnand %p686_p6, %p829_p9 }
 0x181   : > { %p692_p8 = por %p691_p13, %p690_p4 }
 0x182   : > { %p688_p10 = pneg %p687_p7 }
 0x184   : > { %p693_p11 = pnand %p692_p8, %p688_p10 }
 0x186   : > { %696 = shalt.err (!%p693_p11)
}
 0x187   : > { %s761_s26 = smov 128   ;;  %s762_s21 = smov 8  }
 0x188   : > { %549 = dma.vmem_to_hbm [thread:$0]  (%p829_p9), %s918_s30, 512, %s916_s4, %s372_s12, %s761_s26, %s761_s26, %s762_s21  }
 0x189 PF: > { %s417_s28 = sand.u32 1, %s735_s9   ;;  %p978_p12 = scmp.ne.s32.totalorder %s976_s24, 0 }
 0x18a   : > { %p979_p0 = scmp.ge.s32.totalorder %s755_s14, 2  ;;  %s418_s29 = scalar_lea.sflag [#allocation4], %s417_s28 }
 0x18c   : > { %p558_p1 = pnand %p979_p0, %p978_p12 }
 0x18e   : > { %p559_p2 = pneg %p558_p1 }
 0x190   : > { %726 = dma.done.wait (%p559_p2), %s418_s29, 512  }
 0x191   : > { %728 = vsyncadd (%p559_p2), %s418_s29, 4294966784  ;;  %s427_s3 = scalar_lea.sflag [#allocation7], %s417_s28 }
 0x192   : > { %730 = dma.done.wait (%p559_p2), %s427_s3, 16  }
 0x193   : > { %732 = vsyncadd (%p559_p2), %s427_s3, 4294967280  ;;  %s22_s14 = sadd.s32 1, %s755_s14   ;;  %s980_s9 = smov %s739_s10 }
 0x194   : > { %p19_p3 = scmp.ge.s32.totalorder %s22_s14, 4   ;;  %s981_s10 = smov %s743_s11 }
 0x195   : > { %s982_s11 = smov %s834_s23  ;;  %s983_s12 = smov %s751_s13 }
 0x196   : > { %s984_s13 = smov %s986_s17  ;;  %21 = sbr.rel (!%p19_p3) target bundleno = 8 (0x8), region = 90 }
 0x19b   :  { %431 = vsyncpa [#allocation3], 1 }
 0x19c   :  { %433 = vsyncpa [#allocation3 + $0x1], 1 }
 0x19d   :  { %434 = vsyncpa [#allocation4], 1 }
 0x19e   :  { %436 = vsyncpa [#allocation4 + $0x1], 1 }
 0x19f   :  { %437 = vsyncpa [#allocation7], 1 }
 0x1a0   :  { %439 = vsyncpa [#allocation7 + $0x1], 1 }

</bundles_post_ra>
